<compile_context>
chip_gen: v7x
topology: tpu7x:2x2x1
jax: 0.10.0
libtpu: 0.0.40
codegen_flags: <defaults>
</compile_context>

<pallas_src>
import jax
import jax.numpy as jnp
from jax.experimental import pallas as pl
from jax.experimental.pallas import tpu as pltpu

_LANE = 128      # vreg lane width
_SUBLANE = 8     # vreg sublane width (fp32)


def _classify_kernel(x_ref, w_ref, b_ref, o_ref):
    # x_ref: (tile_b, F)   w_ref: (F, C_pad)   b_ref: (1, C_pad)
    # o_ref: (tile_b, C_pad)
    o_ref[...] = (
        jnp.dot(x_ref[...], w_ref[...], preferred_element_type=jnp.float32)
        + b_ref[...]
    )


def _choose_tile_b(B):
    """Batch tile: full-dim block for tiny B, >=2 blocks (multiple of 8) otherwise."""
    if B < 2 * _SUBLANE:
        # Single block whose second-to-last dim equals the full array dim (legal).
        return B
    # At least two grid blocks so v7x's two TensorCores both get work; cap the
    # tile at 1024 rows (keeps double-buffered VMEM footprint < ~10 MiB).
    half = pl.cdiv(B, 2)
    half_aligned = pl.cdiv(half, _SUBLANE) * _SUBLANE
    return min(1024, half_aligned)


def classify_head(x, w_p, b_p, out_features):
    """y = (x @ w_p + b_p)[:, :out_features]  — lane-padded, batch-tiled Pallas GEMV.

    x:   (B, F) float32            backbone features, streamed unpadded from HBM
    w_p: (F, C_pad) float32        pre-padded nn.Linear weight (padded once at init)
    b_p: (1, C_pad) float32        pre-padded bias
    """
    B, F = x.shape
    F_w, C_pad = w_p.shape
    assert F_w == F and C_pad % _LANE == 0

    tile_b = _choose_tile_b(B)
    grid_b = pl.cdiv(B, tile_b)   # ragged final block handled by Pallas

    out = pl.pallas_call(
        _classify_kernel,
        out_shape=jax.ShapeDtypeStruct((B, C_pad), jnp.float32),
        grid=(grid_b,),
        in_specs=[
            # x tile straight from the caller's array; last block dim == full
            # array dim (1000) so no HBM-side padding is needed.
            pl.BlockSpec((tile_b, F), lambda i: (i, 0)),
            # Weight / bias resident across the whole grid (constant index map).
            # (pipeline_mode=pl.Buffered(1) would save ~0.5 MiB VMEM here; left
            #  at the default since the footprint is nowhere near the limit.)
            pl.BlockSpec((F, C_pad), lambda i: (0, 0)),
            pl.BlockSpec((1, C_pad), lambda i: (0, 0)),
        ],
        out_specs=pl.BlockSpec((tile_b, C_pad), lambda i: (i, 0)),
        compiler_params=pltpu.CompilerParams(
            dimension_semantics=("parallel",),   # 2 TCs on v7x; neutral on v5e/v6e
            vmem_limit_bytes=32 * 1024 * 1024,
        ),
    )(x, w_p, b_p)

    return out[:, :out_features]


def tnt_forward(x_features, params):
    """Forward pass of TNT(size='small'):  Classify(TINT(x)).

    TODO(synk): TINT backbone not defined in the given module source; this
    consumes the backbone's (B, 1000) output features directly.
    """
    return classify_head(
        x_features, params["w_padded"], params["b_padded"], params["out_features"]
    )


def init_params(key, in_features=1000, out_features=3):
    """nn.Linear-style init; weight/bias are lane-padded ONCE here (not per call)."""
    kw, kb = jax.random.split(key)
    bound = 1.0 / jnp.sqrt(jnp.float32(in_features))
    w = jax.random.uniform(
        kw, (out_features, in_features), jnp.float32, -bound, bound
    )
    b = jax.random.uniform(kb, (out_features,), jnp.float32, -bound, bound)

    c_pad = pl.cdiv(out_features, _LANE) * _LANE
    w_padded = jnp.zeros((in_features, c_pad), jnp.float32).at[:, :out_features].set(w.T)
    b_padded = jnp.zeros((1, c_pad), jnp.float32).at[:, :out_features].set(b)
    return {
        "w_padded": w_padded,
        "b_padded": b_padded,
        "out_features": out_features,
    }


if __name__ == "__main__":
    key = jax.random.PRNGKey(0)
    k_p, k_x1, k_x2 = jax.random.split(key, 3)

    F, C = 1000, 3  # TNT('small'): Linear(1000, 3) head
    params = init_params(k_p, F, C)
    w_ref = params["w_padded"][:, :C]   # (F, C) unpadded view for the reference
    b_ref = params["b_padded"][:, :C]   # (1, C)

    # B=2: single full-dim block; B=20: 2 grid blocks (tile_b=16) w/ ragged tail.
    for B, kx in ((2, k_x1), (20, k_x2)):
        x_feat = jax.random.normal(kx, (B, F), dtype=jnp.float32)
        out = tnt_forward(x_feat, params)
        out = jax.block_until_ready(out)

        ref = x_feat @ w_ref + b_ref   # PyTorch nn.Linear semantics
        assert out.shape == (B, C)
        assert jnp.allclose(out, ref, atol=1e-4, rtol=1e-4)

    print("KERNEL_OK")
</pallas_src>

<mosaic_0001>
module attributes {stable_mosaic.version = 11 : i64} {
  func.func @_classify_kernel(%arg0: i32, %arg1: memref<2x1000xf32, #tpu.memory_space<vmem>>, %arg2: memref<1000x128xf32, #tpu.memory_space<vmem>>, %arg3: memref<1x128xf32, #tpu.memory_space<vmem>>, %arg4: memref<2x128xf32, #tpu.memory_space<vmem>>) attributes {dimension_semantics = [#tpu.dimension_semantics<parallel>], iteration_bounds = array<i64: 1>, scalar_prefetch = 0 : i64, scratch_operands = 0 : i64, tpu.core_type = #tpu.core_type<tc>, window_params = [{transform_indices = @transform_0, window_bounds = array<i64: 2, 1000>}, {pipeline_mode = #tpu.pipeline_mode<synchronous>, transform_indices = @transform_1, window_bounds = array<i64: 1000, 128>}, {pipeline_mode = #tpu.pipeline_mode<synchronous>, transform_indices = @transform_2, window_bounds = array<i64: 1, 128>}, {transform_indices = @transform_3, window_bounds = array<i64: 2, 128>}]} {
    %c0 = arith.constant 0 : index
    %c0_0 = arith.constant 0 : index
    %0 = vector.load %arg1[%c0, %c0_0] : memref<2x1000xf32, #tpu.memory_space<vmem>>, vector<2x1000xf32>
    %c0_1 = arith.constant 0 : index
    %c0_2 = arith.constant 0 : index
    %1 = vector.load %arg2[%c0_1, %c0_2] : memref<1000x128xf32, #tpu.memory_space<vmem>>, vector<1000x128xf32>
    %cst = arith.constant dense<0.000000e+00> : vector<2x128xf32>
    %2 = tpu.matmul %0, %1, %cst {dimension_numbers = #tpu.dot_dimension_numbers<[1], [0], [0], [1], [0, 0, 1, 1], [], []>} : vector<2x1000xf32>, vector<1000x128xf32>, vector<2x128xf32> -> vector<2x128xf32>
    %c0_3 = arith.constant 0 : index
    %c0_4 = arith.constant 0 : index
    %3 = vector.load %arg3[%c0_3, %c0_4] : memref<1x128xf32, #tpu.memory_space<vmem>>, vector<1x128xf32>
    %4 = vector.broadcast %3 : vector<1x128xf32> to vector<2x128xf32>
    %5 = arith.addf %2, %4 : vector<2x128xf32>
    %c0_5 = arith.constant 0 : index
    %c0_6 = arith.constant 0 : index
    %6 = vector.load %arg4[%c0_5, %c0_6] : memref<2x128xf32, #tpu.memory_space<vmem>>, vector<2x128xf32>
    tpu.vector_store %arg4[%c0_5, %c0_6], %5 {strides = array<i32>} : memref<2x128xf32, #tpu.memory_space<vmem>>, vector<2x128xf32>,
    return
  }
  func.func @transform_0(%arg0: i32) -> (i32, i32) {
    %c0_i32 = arith.constant 0 : i32
    %c0_i32_0 = arith.constant 0 : i32
    return %arg0, %c0_i32 : i32, i32
  }
  func.func @transform_1(%arg0: i32) -> (i32, i32) {
    %c0_i32 = arith.constant 0 : i32
    %c0_i32_0 = arith.constant 0 : i32
    %c0_i32_1 = arith.constant 0 : i32
    return %c0_i32, %c0_i32_0 : i32, i32
  }
  func.func @transform_2(%arg0: i32) -> (i32, i32) {
    %c0_i32 = arith.constant 0 : i32
    %c0_i32_0 = arith.constant 0 : i32
    %c0_i32_1 = arith.constant 0 : i32
    return %c0_i32, %c0_i32_0 : i32, i32
  }
  func.func @transform_3(%arg0: i32) -> (i32, i32) {
    %c0_i32 = arith.constant 0 : i32
    %c0_i32_0 = arith.constant 0 : i32
    return %arg0, %c0_i32 : i32, i32
  }
}

</mosaic_0001>

<bundles_post_ra>
// kernel: tpu_custom_call.1
= control target key start
LH: loop header
LB: loop body
LE: loop exit
PB: predicated region body
PF: predicated region fallthrough
CT: control target
= control target key end

     0   :  { %8 = vsyncpa [#allocation3], 0  ;;  %s949_s0 = inlined_call_operand.hbm [shape: f32[2,1000], index: 0, kind: input, shape index: {}]   ;;  %s950_s1 = inlined_call_operand.hbm [shape: f32[1000,128], index: 1, kind: input, shape index: {}]   ;;  %s951_s2 = inlined_call_operand.vmem [shape: f32[1,128], index: 2, kind: input, shape index: {}]   ;;  %s952_s3 = inlined_call_operand.hbm [shape: f32[2,128], index: 3, kind: output, shape index: {}]  }
   0x1   :  { %9 = vsyncpa [#allocation6], 0 }
   0x2   :  { %10 = vsyncpa [#allocation4], 0  ;;  %s845_s12 = smov [#allocation2]   ;;  %s846_s14 = smov [#allocation5]  }
   0x3   :  { %s17_s13 = sshll.u32 %s845_s12, 4  ;;  %s26_s15 = sshll.u32 %s846_s14, 4  ;;  %s18_s13 = int_to_ptr.vmem [resolvable:$true] %s17_s13  ;;  %s873_s15 = int_to_ptr.vmem [resolvable:$true] %s26_s15 }
   0x4   :  { %s773_s18 = scalar_lea.hbm %s949_s0, 256 }
   0x5   :  { %p774_p0 = scmp.ne.s32.totalorder %s949_s0, %s773_s18  ;;  %p777_p1 = scmp.lt.u32.totalorder %s773_s18, %s949_s0 }
   0x7   :  { %p779_p2 = pnand %p777_p1, %p774_p0 }
   0x9   :  { %782 = shalt.err (!%p779_p2)
}
   0xa   :  { %s783_s23 = scalar_lea.vmem %s18_s13, 256  ;;  %p788_p4 = scmp.lt.s32.totalorder %s18_s13, %s18_s13 }
   0xb   :  { %p784_p3 = scmp.ne.s32.totalorder %s18_s13, %s783_s23  ;;  %p789_p5 = scmp.lt.s32.totalorder %s783_s23, %s783_s23 }
   0xd   :  { %p790_p6 = por %p789_p5, %p788_p4 }
   0xf   :  { %p791_p7 = pnand %p790_p6, %p784_p3 }
  0x11   :  { %794 = shalt.err (!%p791_p7)
}
  0x12   :  { %20 = dma.hbm_to_vmem [thread:$0]  %s949_s0, 256, %s18_s13, [#allocation3]  }
  0x13   :  { %s795_s28 = scalar_lea.hbm %s950_s1, 16000 }
  0x14   :  { %p796_p8 = scmp.ne.s32.totalorder %s950_s1, %s795_s28  ;;  %p799_p9 = scmp.lt.u32.totalorder %s795_s28, %s950_s1 }
  0x16   :  { %p801_p10 = pnand %p799_p9, %p796_p8 }
  0x18   :  { %804 = shalt.err (!%p801_p10)
}
  0x19   :  { %s805_s6 = scalar_lea.vmem %s873_s15, 16000  ;;  %p810_p12 = scmp.lt.s32.totalorder %s873_s15, %s873_s15 }
  0x1a   :  { %p806_p11 = scmp.ne.s32.totalorder %s873_s15, %s805_s6  ;;  %p811_p13 = scmp.lt.s32.totalorder %s805_s6, %s805_s6 }
  0x1c   :  { %p812_p0 = por %p811_p13, %p810_p12 }
  0x1e   :  { %p813_p1 = pnand %p812_p0, %p806_p11 }
  0x20   :  { %816 = shalt.err (!%p813_p1)
}
  0x21   :  { %s847_s0 = smov 128   ;;  %s848_s7 = smov 8  }
  0x22   :  { %32 = dma.hbm_to_vmem [thread:$0]  %s950_s1, 16000, %s873_s15, [#allocation6], %s847_s0, %s847_s0, %s848_s7  }
  0x23   :  { %839 = dma.done.wait [#allocation3], 256  }
  0x24   :  { %840 = vsyncadd [#allocation3], 4294967040 }
  0x25   :  { %841 = dma.done.wait [#allocation6], 16000  }
  0x26   :  { %842 = vsyncadd [#allocation6], 4294951296  ;;  %v59_v0 = vld [vmem:[#allocation5 + $0x80] sm:$0xff]  ;;  %v60_v1 = vld [vmem:[#allocation5 + $0x88] sm:$0xff]  ;;  %v849_v47 = vmov 1983009808   ;;  %v181_v49 = vlaneseq }
  0x27   :  { %v91_v2 = vld [vmem:[#allocation5 + $0x180] sm:$0xff]  ;;  %v625_v3 = vpack.c.bf16 %v60_v1, %v59_v0  ;;  %v92_v4 = vld [vmem:[#allocation5 + $0x188] sm:$0xff]  ;;  %v61_v11 = vld [vmem:[#allocation5 + $0x90] sm:$0xff]  ;;  %v179_v48 = vunpack.c.l.s4 %v849_v47  ;;  %vm218_vm0 = vcmask 850944   ;;  %s852_s11 = smov [#allocation7]  }
  0x28   :  { %v43_v5 = vld [vmem:[#allocation5] sm:$0xff]  ;;  %v44_v6 = vld [vmem:[#allocation5 + $0x8] sm:$0xff]  ;;  %v657_v7 = vpack.c.bf16 %v92_v4, %v91_v2  ;;  %v62_v13 = vld [vmem:[#allocation5 + $0x98] sm:$0xff]  ;;  %v182_v0 = vshrl.u32 %v181_v49, 7  ;;  %s508_s12 = sshll.u32 %s852_s11, 4  ;;  %s509_s12 = int_to_ptr.vmem [resolvable:$true] %s508_s12 }
  0x29   :  { %v627_v8 = vpack.c.bf16 %v44_v6, %v43_v5  ;;  %v75_v9 = vld [vmem:[#allocation5 + $0x100] sm:$0xff]  ;;  %v76_v10 = vld [vmem:[#allocation5 + $0x108] sm:$0xff]  ;;  %626 = vmatprep.subr.bf16.mxu0 %v625_v3  ;;  %v93_v14 = vld [vmem:[#allocation5 + $0x190] sm:$0xff]  ;;  %v629_v16 = vpack.c.bf16 %v62_v13, %v61_v11  ;;  %v180_v63 = vunpack.c.0.s8 %v179_v48  ;;  %s817_s13 = scalar_lea.vmem %s509_s12, 32  ;;  %p822_p3 = scmp.lt.s32.totalorder %s509_s12, %s509_s12 }
  0x2a   :  { %v659_v12 = vpack.c.bf16 %v76_v10, %v75_v9  ;;  %v94_v15 = vld [vmem:[#allocation5 + $0x198] sm:$0xff]  ;;  %658 = vmatprep.subr.bf16.mxu1 %v657_v7  ;;  %v45_v18 = vld [vmem:[#allocation5 + $0x10] sm:$0xff]  ;;  %v63_v23 = vld [vmem:[#allocation5 + $0xa0] sm:$0xff]  ;;  %p818_p2 = scmp.ne.s32.totalorder %s509_s12, %s817_s13  ;;  %p823_p4 = scmp.lt.s32.totalorder %s817_s13, %s817_s13 }
  0x2b   :  { %628 = vmatpush3.bf16.msra.mxu0 %v627_v8  ;;  %v661_v17 = vpack.c.bf16 %v94_v15, %v93_v14  ;;  %v46_v19 = vld [vmem:[#allocation5 + $0x18] sm:$0xff]  ;;  %v77_v20 = vld [vmem:[#allocation5 + $0x110] sm:$0xff]  ;;  %v64_v24 = vld [vmem:[#allocation5 + $0xa8] sm:$0xff]  ;;  %v904_v13 = vsub.s32 %v180_v63, %v182_v0 }
  0x2c   :  { %660 = vmatpush3.bf16.msra.mxu1 %v659_v12  ;;  %v631_v21 = vpack.c.bf16 %v46_v19, %v45_v18  ;;  %v78_v22 = vld [vmem:[#allocation5 + $0x118] sm:$0xff]  ;;  %630 = vmatprep.subr.bf16.mxu0 %v629_v16  ;;  %v633_v26 = vpack.c.bf16 %v64_v24, %v63_v23  ;;  %v95_v27 = vld [vmem:[#allocation5 + $0x1a0] sm:$0xff]  ;;  %v96_v28 = vld [vmem:[#allocation5 + $0x1a8] sm:$0xff]  ;;  %p824_p5 = por %p823_p4, %p822_p3 }
  0x2d   :  { %662 = vmatprep.subr.bf16.mxu1 %v661_v17  ;;  %v663_v25 = vpack.c.bf16 %v78_v22, %v77_v20  ;;  %v47_v29 = vld [vmem:[#allocation5 + $0x20] sm:$0xff]  ;;  %v665_v30 = vpack.c.bf16 %v96_v28, %v95_v27  ;;  %v48_v31 = vld [vmem:[#allocation5 + $0x28] sm:$0xff]  ;;  %v65_v35 = vld [vmem:[#allocation5 + $0xb0] sm:$0xff] }
  0x2e   :  { %v79_v32 = vld [vmem:[#allocation5 + $0x120] sm:$0xff]  ;;  %v80_v33 = vld [vmem:[#allocation5 + $0x128] sm:$0xff]  ;;  %v635_v34 = vpack.c.bf16 %v48_v31, %v47_v29  ;;  %v66_v36 = vld [vmem:[#allocation5 + $0xb8] sm:$0xff]  ;;  %p825_p6 = pnand %p824_p5, %p818_p2 }
  0x2f   :  { %632 = vmatpush3.bf16.msra.mxu0 %v631_v21  ;;  %v97_v37 = vld [vmem:[#allocation5 + $0x1b0] sm:$0xff]  ;;  %v667_v38 = vpack.c.bf16 %v80_v33, %v79_v32  ;;  %v637_v39 = vpack.c.bf16 %v66_v36, %v65_v35  ;;  %v98_v40 = vld [vmem:[#allocation5 + $0x1b8] sm:$0xff]  ;;  %v67_v46 = vld [vmem:[#allocation5 + $0xc0] sm:$0xff] }
  0x30   :  { %664 = vmatpush3.bf16.msra.mxu1 %v663_v25  ;;  %634 = vmatprep.subr.bf16.mxu0 %v633_v26  ;;  %v49_v41 = vld [vmem:[#allocation5 + $0x30] sm:$0xff]  ;;  %v50_v42 = vld [vmem:[#allocation5 + $0x38] sm:$0xff]  ;;  %v669_v43 = vpack.c.bf16 %v98_v40, %v97_v37  ;;  %v68_v50 = vld [vmem:[#allocation5 + $0xc8] sm:$0xff] }
  0x31   :  { %666 = vmatprep.subr.bf16.mxu1 %v665_v30  ;;  %v81_v44 = vld [vmem:[#allocation5 + $0x130] sm:$0xff]  ;;  %v82_v45 = vld [vmem:[#allocation5 + $0x138] sm:$0xff]  ;;  %v99_v51 = vld [vmem:[#allocation5 + $0x1c0] sm:$0xff]  ;;  %v639_v53 = vpack.c.bf16 %v50_v42, %v49_v41  ;;  %v641_v55 = vpack.c.bf16 %v68_v50, %v67_v46 }
  0x32   :  { %v100_v52 = vld [vmem:[#allocation5 + $0x1c8] sm:$0xff]  ;;  %v671_v54 = vpack.c.bf16 %v82_v45, %v81_v44  ;;  %v51_v56 = vld [vmem:[#allocation5 + $0x40] sm:$0xff]  ;;  %v69_v61 = vld [vmem:[#allocation5 + $0xd0] sm:$0xff] }
  0x33   :  { %636 = vmatpush3.bf16.msra.mxu0 %v635_v34  ;;  %v52_v57 = vld [vmem:[#allocation5 + $0x48] sm:$0xff]  ;;  %v83_v58 = vld [vmem:[#allocation5 + $0x140] sm:$0xff]  ;;  %v673_v59 = vpack.c.bf16 %v100_v52, %v99_v51  ;;  %v70_v62 = vld [vmem:[#allocation5 + $0xd8] sm:$0xff] }
  0x34   :  { %668 = vmatpush3.bf16.msra.mxu1 %v667_v38  ;;  %638 = vmatprep.subr.bf16.mxu0 %v637_v39  ;;  %v84_v60 = vld [vmem:[#allocation5 + $0x148] sm:$0xff]  ;;  %v101_v1 = vld [vmem:[#allocation5 + $0x1d0] sm:$0xff]  ;;  %v102_v2 = vld [vmem:[#allocation5 + $0x1d8] sm:$0xff]  ;;  %v643_v3 = vpack.c.bf16 %v52_v57, %v51_v56  ;;  %v645_v5 = vpack.c.bf16 %v70_v62, %v69_v61 }
  0x35   :  { %670 = vmatprep.subr.bf16.mxu1 %v669_v43  ;;  %v675_v4 = vpack.c.bf16 %v84_v60, %v83_v58  ;;  %v53_v6 = vld [vmem:[#allocation5 + $0x50] sm:$0xff]  ;;  %v54_v7 = vld [vmem:[#allocation5 + $0x58] sm:$0xff]  ;;  %v677_v9 = vpack.c.bf16 %v102_v2, %v101_v1  ;;  %v71_v11 = vld [vmem:[#allocation5 + $0xe0] sm:$0xff] }
  0x36   :  { %v85_v8 = vld [vmem:[#allocation5 + $0x150] sm:$0xff]  ;;  %v86_v10 = vld [vmem:[#allocation5 + $0x158] sm:$0xff]  ;;  %v72_v12 = vld [vmem:[#allocation5 + $0xe8] sm:$0xff]  ;;  %v647_v16 = vpack.c.bf16 %v54_v7, %v53_v6 }
  0x37   :  { %640 = vmatpush3.bf16.msra.mxu0 %v639_v53  ;;  %v103_v14 = vld [vmem:[#allocation5 + $0x1e0] sm:$0xff]  ;;  %v104_v15 = vld [vmem:[#allocation5 + $0x1e8] sm:$0xff]  ;;  %v679_v18 = vpack.c.bf16 %v86_v10, %v85_v8  ;;  %v649_v19 = vpack.c.bf16 %v72_v12, %v71_v11  ;;  %v41_v22 = vld [vmem:[#allocation2] sm:$0xff] }
  0x38   :  { %672 = vmatpush3.bf16.msra.mxu1 %v671_v54  ;;  %642 = vmatprep.subr.bf16.mxu0 %v641_v55  ;;  %v55_v17 = vld [vmem:[#allocation5 + $0x60] sm:$0xff]  ;;  %v56_v20 = vld [vmem:[#allocation5 + $0x68] sm:$0xff]  ;;  %v681_v23 = vpack.c.bf16 %v104_v15, %v103_v14  ;;  %v73_v25 = vld [vmem:[#allocation5 + $0xf0] sm:$0xff]  ;;  %v184_v27 = vrot.slane %v41_v22, %v904_v13  ;;  %v177_v28 = vcombine.high %v41_v22, %v41_v22 }
  0x39   :  { %674 = vmatprep.subr.bf16.mxu1 %v673_v59  ;;  %v87_v21 = vld [vmem:[#allocation5 + $0x160] sm:$0xff]  ;;  %v88_v24 = vld [vmem:[#allocation5 + $0x168] sm:$0xff]  ;;  %v74_v26 = vld [vmem:[#allocation5 + $0xf8] sm:$0xff]  ;;  %v651_v31 = vpack.c.bf16 %v56_v20, %v55_v17  ;;  %v850_v59 = vmov 0.0|0.0  }
  0x3a   :  { %v105_v29 = vld [vmem:[#allocation5 + $0x1f0] sm:$0xff]  ;;  %v106_v30 = vld [vmem:[#allocation5 + $0x1f8] sm:$0xff]  ;;  %v192_v32 = vcombine.high %v184_v27, %v184_v27  ;;  %v191_v33 = vrot.slane %v177_v28, %v904_v13  ;;  %v683_v34 = vpack.c.bf16 %v88_v24, %v87_v21  ;;  %v653_v35 = vpack.c.bf16 %v74_v26, %v73_v25  ;;  %v123_v42 = vld [vmem:[#allocation5 + $0x280] sm:$0xff] }
  0x3b   :  { %644 = vmatpush3.bf16.msra.mxu0 %v643_v3  ;;  %v57_v36 = vld [vmem:[#allocation5 + $0x70] sm:$0xff]  ;;  %v58_v37 = vld [vmem:[#allocation5 + $0x78] sm:$0xff]  ;;  %v685_v39 = vpack.c.bf16 %v106_v30, %v105_v29  ;;  %v124_v43 = vld [vmem:[#allocation5 + $0x288] sm:$0xff] }
  0x3c   :  { %676 = vmatpush3.bf16.msra.mxu1 %v675_v4  ;;  %646 = vmatprep.subr.bf16.mxu0 %v645_v5  ;;  %v89_v38 = vld [vmem:[#allocation5 + $0x170] sm:$0xff]  ;;  %v90_v40 = vld [vmem:[#allocation5 + $0x178] sm:$0xff]  ;;  %v193_v41 = vcombine.high %v191_v33, %v191_v33  ;;  %v655_v44 = vpack.c.bf16 %v58_v37, %v57_v36  ;;  %v689_v46 = vpack.c.bf16 %v124_v43, %v123_v42  ;;  %v107_v47 = vld [vmem:[#allocation5 + $0x200] sm:$0xff] }
  0x3d   :  { %678 = vmatprep.subr.bf16.mxu1 %v677_v9  ;;  %285 = vmatprep.mubr.f32.mxu0 %v192_v32  ;;  %v687_v45 = vpack.c.bf16 %v90_v40, %v89_v38  ;;  %v108_v48 = vld [vmem:[#allocation5 + $0x208] sm:$0xff]  ;;  %v139_v49 = vld [vmem:[#allocation5 + $0x300] sm:$0xff]  ;;  %v125_v51 = vld [vmem:[#allocation5 + $0x290] sm:$0xff] }
  0x3e   :  { %355 = vmatprep.mubr.f32.mxu1 %v193_v41  ;;  %v140_v50 = vld [vmem:[#allocation5 + $0x308] sm:$0xff]  ;;  %v126_v52 = vld [vmem:[#allocation5 + $0x298] sm:$0xff]  ;;  %v691_v53 = vpack.c.bf16 %v108_v48, %v107_v47  ;;  %v109_v56 = vld [vmem:[#allocation5 + $0x210] sm:$0xff] }
  0x3f   :  { %648 = vmatpush3.bf16.msra.mxu0 %v647_v16  ;;  %v722_v54 = vpack.c.bf16 %v140_v50, %v139_v49  ;;  %v693_v55 = vpack.c.bf16 %v126_v52, %v125_v51  ;;  %v110_v57 = vld [vmem:[#allocation5 + $0x218] sm:$0xff]  ;;  %v141_v58 = vld [vmem:[#allocation5 + $0x310] sm:$0xff]  ;;  %v127_v61 = vld [vmem:[#allocation5 + $0x2a0] sm:$0xff] }
  0x40   :  { %680 = vmatpush3.bf16.msra.mxu1 %v679_v18  ;;  %650 = vmatprep.subr.bf16.mxu0 %v649_v19  ;;  %v142_v60 = vld [vmem:[#allocation5 + $0x318] sm:$0xff]  ;;  %v128_v62 = vld [vmem:[#allocation5 + $0x2a8] sm:$0xff]  ;;  %v695_v63 = vpack.c.bf16 %v110_v57, %v109_v56  ;;  %v111_v0 = vld [vmem:[#allocation5 + $0x220] sm:$0xff] }
  0x41   :  { %682 = vmatprep.subr.bf16.mxu1 %v681_v23  ;;  %v725_v1 = vpack.c.bf16 %v142_v60, %v141_v58  ;;  %v697_v2 = vpack.c.bf16 %v128_v62, %v127_v61  ;;  %v112_v3 = vld [vmem:[#allocation5 + $0x228] sm:$0xff]  ;;  %v143_v4 = vld [vmem:[#allocation5 + $0x320] sm:$0xff]  ;;  %v42_v5 = vld [vmem:[#allocation2 + $0x8] sm:$0xff] }
  0x42   :  { %v144_v6 = vld [vmem:[#allocation5 + $0x328] sm:$0xff]  ;;  %v129_v7 = vld [vmem:[#allocation5 + $0x2b0] sm:$0xff]  ;;  %v130_v8 = vld [vmem:[#allocation5 + $0x2b8] sm:$0xff]  ;;  %v194_v9 = vcombine.high %v42_v5, %v42_v5  ;;  %v911_v10 = vrot.slane %v42_v5, %v904_v13  ;;  %v699_v11 = vpack.c.bf16 %v112_v3, %v111_v0 }
  0x43   :  { %652 = vmatpush3.bf16.msra.mxu0 %v651_v31  ;;  %v728_v15 = vpack.c.bf16 %v144_v6, %v143_v4  ;;  %v701_v16 = vpack.c.bf16 %v130_v8, %v129_v7  ;;  %v113_v17 = vld [vmem:[#allocation5 + $0x230] sm:$0xff]  ;;  %v114_v18 = vld [vmem:[#allocation5 + $0x238] sm:$0xff]  ;;  %v131_v21 = vld [vmem:[#allocation5 + $0x2c0] sm:$0xff] }
  0x44   :  { %684 = vmatpush3.bf16.msra.mxu1 %v683_v34  ;;  %654 = vmatprep.subr.bf16.mxu0 %v653_v35  ;;  %v209_v12 = vcombine.high %v911_v10, %v911_v10  ;;  %v916_v14 = vrot.slane %v194_v9, %v904_v13  ;;  %v145_v19 = vld [vmem:[#allocation5 + $0x330] sm:$0xff]  ;;  %v146_v20 = vld [vmem:[#allocation5 + $0x338] sm:$0xff]  ;;  %v132_v22 = vld [vmem:[#allocation5 + $0x2c8] sm:$0xff]  ;;  %v703_v13 = vpack.c.bf16 %v114_v18, %v113_v17 }
  0x45   :  { %686 = vmatprep.subr.bf16.mxu1 %v685_v39  ;;  %v731_v24 = vpack.c.bf16 %v146_v20, %v145_v19  ;;  %v705_v25 = vpack.c.bf16 %v132_v22, %v131_v21  ;;  %v115_v26 = vld [vmem:[#allocation5 + $0x240] sm:$0xff]  ;;  %v148_v29 = vld [vmem:[#allocation5 + $0x348] sm:$0xff]  ;;  %v133_v30 = vld [vmem:[#allocation5 + $0x2d0] sm:$0xff] }
  0x46   :  { %v210_v23 = vcombine.high %v916_v14, %v916_v14  ;;  %v147_v28 = vld [vmem:[#allocation5 + $0x340] sm:$0xff]  ;;  %v134_v31 = vld [vmem:[#allocation5 + $0x2d8] sm:$0xff]  ;;  %v117_v35 = vld [vmem:[#allocation5 + $0x250] sm:$0xff] }
  0x47   :  { %656 = vmatpush3.bf16.msra.mxu0 %v655_v44  ;;  %v709_v34 = vpack.c.bf16 %v134_v31, %v133_v30  ;;  %v118_v36 = vld [vmem:[#allocation5 + $0x258] sm:$0xff]  ;;  %v149_v37 = vld [vmem:[#allocation5 + $0x350] sm:$0xff]  ;;  %v135_v39 = vld [vmem:[#allocation5 + $0x2e0] sm:$0xff] }
  0x48   :  { %688 = vmatpush3.bf16.msra.mxu1 %v687_v45  ;;  %690 = vmatprep.subr.bf16.mxu0 %v689_v46  ;;  %v150_v38 = vld [vmem:[#allocation5 + $0x358] sm:$0xff]  ;;  %v136_v40 = vld [vmem:[#allocation5 + $0x2e8] sm:$0xff]  ;;  %v711_v41 = vpack.c.bf16 %v118_v36, %v117_v35  ;;  %v119_v44 = vld [vmem:[#allocation5 + $0x260] sm:$0xff] }
  0x49   :  { %721 = vmatprep.subr.bf16.mxu1 %v850_v59  ;;  %v737_v42 = vpack.c.bf16 %v150_v38, %v149_v37  ;;  %v713_v43 = vpack.c.bf16 %v136_v40, %v135_v39  ;;  %v120_v45 = vld [vmem:[#allocation5 + $0x268] sm:$0xff]  ;;  %v151_v46 = vld [vmem:[#allocation5 + $0x360] sm:$0xff]  ;;  %v137_v48 = vld [vmem:[#allocation5 + $0x2f0] sm:$0xff] }
  0x4a   :  { %286 = vmatmul.mubr.f32.vlgmr.msra.gmra.mrb[0].mxu0 %v184_v27  ;;  %v116_v27 = vld [vmem:[#allocation5 + $0x248] sm:$0xff]  ;;  %v138_v49 = vld [vmem:[#allocation5 + $0x2f8] sm:$0xff]  ;;  %v715_v50 = vpack.c.bf16 %v120_v45, %v119_v44  ;;  %v155_v60 = vld [vmem:[#allocation5 + $0x380] sm:$0xff] }
  0x4b   :  { %356 = vmatmul.mubr.f32.vlgmr.msra.gmra.mrb[0].mxu1 %v191_v33  ;;  %692 = vmatpush3.bf16.msra.mxu0 %v691_v53  ;;  %v707_v32 = vpack.c.bf16 %v116_v27, %v115_v26  ;;  %v734_v33 = vpack.c.bf16 %v148_v29, %v147_v28  ;;  %v152_v47 = vld [vmem:[#allocation5 + $0x368] sm:$0xff]  ;;  %v717_v52 = vpack.c.bf16 %v138_v49, %v137_v48  ;;  %v121_v53 = vld [vmem:[#allocation5 + $0x270] sm:$0xff]  ;;  %v154_v56 = vld [vmem:[#allocation5 + $0x378] sm:$0xff] }
  0x4c   :  { %723 = vmatpush1.bf16.msra.mxu1 %v722_v54  ;;  %694 = vmatprep.subr.bf16.mxu0 %v693_v55  ;;  %v740_v51 = vpack.c.bf16 %v152_v47, %v151_v46  ;;  %v122_v54 = vld [vmem:[#allocation5 + $0x278] sm:$0xff]  ;;  %v153_v55 = vld [vmem:[#allocation5 + $0x370] sm:$0xff]  ;;  %v156_v61 = vld [vmem:[#allocation5 + $0x388] sm:$0xff] }
  0x4d   :  { %724 = vmatprep.subr.bf16.mxu1 %v850_v59  ;;  %425 = vmatprep.mubr.f32.mxu0 %v209_v12  ;;  %v719_v57 = vpack.c.bf16 %v122_v54, %v121_v53  ;;  %v743_v58 = vpack.c.bf16 %v154_v56, %v153_v55  ;;  %v746_v62 = vpack.c.bf16 %v156_v61, %v155_v60  ;;  %v158_v0 = vld [vmem:[#allocation5 + $0x398] sm:$0xff]  ;;  %v160_v3 = vld [vmem:[#allocation5 + $0x3a8] sm:$0xff]  ;;  %v161_v5 = vld [vmem:[#allocation5 + $0x3b0] sm:$0xff] }
  0x4e   :  { %519 = vmatprep.mubr.msk.f32.mxu1 %vm218_vm0, %v210_v23  ;;  %v162_v6 = vld [vmem:[#allocation5 + $0x3b8] sm:$0xff]  ;;  %v163_v8 = vld [vmem:[#allocation5 + $0x3c0] sm:$0xff]  ;;  %v164_v9 = vld [vmem:[#allocation5 + $0x3c8] sm:$0xff] }
  0x4f   :  { %696 = vmatpush3.bf16.msra.mxu0 %v695_v63  ;;  %v157_v63 = vld [vmem:[#allocation5 + $0x390] sm:$0xff]  ;;  %v755_v7 = vpack.c.bf16 %v162_v6, %v161_v5  ;;  %v166_v12 = vld [vmem:[#allocation5 + $0x3d8] sm:$0xff]  ;;  %v167_v17 = vld [vmem:[#allocation5 + $0x3e0] sm:$0xff] }
  0x50   :  { %726 = vmatpush1.bf16.msra.mxu1 %v725_v1  ;;  %698 = vmatprep.subr.bf16.mxu0 %v697_v2  ;;  %v749_v1 = vpack.c.bf16 %v158_v0, %v157_v63  ;;  %v159_v2 = vld [vmem:[#allocation5 + $0x3a0] sm:$0xff]  ;;  %v518_v20 = vld [vmem:[%s951_s2] ss:$0 sm:$0xff] }
  0x51   :  { %727 = vmatprep.subr.bf16.mxu1 %v850_v59  ;;  %v752_v4 = vpack.c.bf16 %v160_v3, %v159_v2 }
  0x53   :  { %700 = vmatpush3.bf16.msra.mxu0 %v699_v11  ;;  %v165_v11 = vld [vmem:[#allocation5 + $0x3d0] sm:$0xff] }
  0x54   :  { %729 = vmatpush1.bf16.msra.mxu1 %v728_v15  ;;  %702 = vmatprep.subr.bf16.mxu0 %v701_v16  ;;  %v761_v15 = vpack.c.bf16 %v166_v12, %v165_v11  ;;  %v851_v16 = vmov 0.0  }
  0x55   :  { %730 = vmatprep.subr.bf16.mxu1 %v850_v59 }
  0x57   :  { %704 = vmatpush3.bf16.msra.mxu0 %v703_v13 }
  0x58   :  { %732 = vmatpush1.bf16.msra.mxu1 %v731_v24  ;;  %706 = vmatprep.subr.bf16.mxu0 %v705_v25 }
  0x59   :  { %733 = vmatprep.subr.bf16.mxu1 %v850_v59 }
  0x5b   :  { %708 = vmatpush3.bf16.msra.mxu0 %v707_v32 }
  0x5c   :  { %735 = vmatpush1.bf16.msra.mxu1 %v734_v33  ;;  %710 = vmatprep.subr.bf16.mxu0 %v709_v34 }
  0x5d   :  { %736 = vmatprep.subr.bf16.mxu1 %v850_v59 }
  0x5f   :  { %712 = vmatpush3.bf16.msra.mxu0 %v711_v41 }
  0x60   :  { %738 = vmatpush1.bf16.msra.mxu1 %v737_v42  ;;  %714 = vmatprep.subr.bf16.mxu0 %v713_v43 }
  0x61   :  { %739 = vmatprep.subr.bf16.mxu1 %v850_v59 }
  0x63   :  { %716 = vmatpush3.bf16.msra.mxu0 %v715_v50 }
  0x64   :  { %741 = vmatpush1.bf16.msra.mxu1 %v740_v51  ;;  %718 = vmatprep.subr.bf16.mxu0 %v717_v52 }
  0x65   :  { %742 = vmatprep.subr.bf16.mxu1 %v850_v59 }
  0x67   :  { %720 = vmatpush3.bf16.msra.mxu0 %v719_v57 }
  0x68   :  { %744 = vmatpush1.bf16.msra.mxu1 %v743_v58 }
  0x69   :  { %745 = vmatprep.subr.bf16.mxu1 %v850_v59 }
  0x6a   :  { %426 = vmatmul.mubr.f32.vlgmr.msra.gmra.mrb[2].mxu0 %v911_v10  ;;  %v758_v10 = vpack.c.bf16 %v164_v9, %v163_v8 }
  0x6c   :  { %747 = vmatpush1.bf16.msra.mxu1 %v746_v62 }
  0x6d   :  { %748 = vmatprep.subr.bf16.mxu1 %v850_v59 }
  0x70   :  { %750 = vmatpush1.bf16.msra.mxu1 %v749_v1 }
  0x71   :  { %751 = vmatprep.subr.bf16.mxu1 %v850_v59 }
  0x74   :  { %753 = vmatpush1.bf16.msra.mxu1 %v752_v4 }
  0x75   :  { %754 = vmatprep.subr.bf16.mxu1 %v850_v59 }
  0x78   :  { %756 = vmatpush1.bf16.msra.mxu1 %v755_v7 }
  0x79   :  { %757 = vmatprep.subr.bf16.mxu1 %v850_v59 }
  0x7c   :  { %759 = vmatpush1.bf16.msra.mxu1 %v758_v10 }
  0x7d   :  { %760 = vmatprep.subr.bf16.mxu1 %v850_v59 }
  0x80   :  { %762 = vmatpush1.bf16.msra.mxu1 %v761_v15 }
  0x81   :  { %487 = vmatprep.subr.mxu1 %v851_v16 }
  0x84   :  { %488 = vmatpush1.msra.mxu1 %v167_v17 }
  0x85   :  { %496 = vmatmul.mubr.f32.vlgmr.msra.gmra.mrb[2].mxu1 %v916_v14 }
 0x11d   :  { %v552_v18 = vpop.f32.mrb[0].mxu0 }
 0x11e   :  { %v587_v19 = vpop.f32.mrb[0].mxu1  ;;  %v553_v21 = vpop.f32.mrb[1].mxu0 }
 0x11f   :  { %v554_v22 = vadd.f32 %v553_v21, %v552_v18  ;;  %v588_v23 = vpop.f32.mrb[1].mxu1 }
 0x120   :  { %v589_v13 = vadd.f32 %v588_v23, %v587_v19 }
 0x121   :  { %v288_v24 = vadd.f32 %v554_v22, %v518_v20 }
 0x123   :  { %v358_v25 = vadd.f32 %v589_v13, %v288_v24 }
 0x13d   :  { %v622_v59 = vpop.f32.mrb[2].mxu0 }
 0x13e   :  { %v623_v26 = vpop.f32.mrb[3].mxu0 }
 0x13f   :  { %v624_v27 = vadd.f32 %v623_v26, %v622_v59 }
 0x141   :  { %v428_v28 = vadd.f32 %v624_v27, %v358_v25 }
 0x158   :  { %v497_v29 = vpop.f32.mrb[2].mxu1 }
 0x159   :  { %v498_v14 = vadd.f32 %v497_v29, %v428_v28  ;;  %v499_v30 = vpop.f32.mrb[3].mxu1 }
 0x15b   :  { %501 = vst [vmem:[#allocation7] sm:$0x3] %v498_v14 }
 0x15c   :  { %828 = shalt.err (!%p825_p6)
}
 0x15d   :  { %s829_s15 = scalar_lea.hbm %s952_s3, 32 }
 0x15e   :  { %p830_p7 = scmp.ne.s32.totalorder %s952_s3, %s829_s15  ;;  %p833_p8 = scmp.lt.u32.totalorder %s829_s15, %s952_s3 }
 0x160   :  { %p835_p9 = pnand %p833_p8, %p830_p7 }
 0x162   :  { %838 = shalt.err (!%p835_p9)
}
 0x163   :  { %511 = dma.vmem_to_hbm [thread:$0]  %s509_s12, 32, %s952_s3, [#allocation4]  }
 0x164   :  { %843 = dma.done.wait [#allocation4], 32  }
 0x165   :  { %844 = vsyncadd [#allocation4], 4294967264 }
 0x166   :  { %515 = vsyncpa [#allocation3], 1 }
 0x167   :  { %516 = vsyncpa [#allocation6], 1 }
 0x168   :  { %517 = vsyncpa [#allocation4], 1 }

</bundles_post_ra>
